<compile_context>
chip_gen: v7x
topology: tpu7x:2x2x1
jax: 0.10.0
libtpu: 0.0.40
codegen_flags: <defaults>
</compile_context>

<pallas_src>
import math
from functools import partial

import jax
import jax.numpy as jnp
from jax import lax
from jax.experimental import pallas as pl
from jax.experimental.pallas import tpu as pltpu


# ----------------------------- helpers ------------------------------------

def _round_up(n, m):
    return ((n + m - 1) // m) * m


# ----------------- nearest 2x upsample kernel (no-conv path) ---------------

def _upsample2x_kernel(x_ref, o_ref):
    v = x_ref[0]                                             # (TH, W, C)
    d = jnp.concatenate([v, v], axis=-1).astype(o_ref.dtype)  # (TH, W, 2C) col dup in lanes
    o_ref[0, :, 0, :, :] = d                                 # output row 2i
    o_ref[0, :, 1, :, :] = d                                 # output row 2i+1


def _pick_row_tile(h, w, c, itemsize, budget=4 << 20):
    """Largest divisor of h whose double-buffered in+out blocks fit `budget` bytes."""
    best = 1
    for th in range(1, h + 1):
        if h % th:
            continue
        in_b = th * w * c * itemsize
        out_b = th * 2 * w * 2 * c * itemsize
        if 2 * (in_b + out_b) <= budget:
            best = th
    return best


def upsample_nearest_2x(x):
    """x: (B, H, W, C) NHWC -> (B, 2H, 2W, C) nearest-neighbor upsample (same dtype)."""
    B, H, W, C = x.shape
    # TODO(synk): for C not a multiple of 64 the (...,2C) store is lane-masked;
    # fold W into the lane dim in that case for unmasked stores.
    th = _pick_row_tile(H, W, C, jnp.dtype(x.dtype).itemsize)
    out5 = pl.pallas_call(
        _upsample2x_kernel,
        grid=(B, H // th),
        in_specs=[pl.BlockSpec((1, th, W, C), lambda b, t: (b, t, 0, 0))],
        out_specs=pl.BlockSpec((1, th, 2, W, 2 * C), lambda b, t: (b, t, 0, 0, 0)),
        out_shape=jax.ShapeDtypeStruct((B, H, 2, W, 2 * C), x.dtype),
        compiler_params=pltpu.CompilerParams(
            dimension_semantics=("parallel", "parallel"),
            vmem_limit_bytes=32 * 1024 * 1024),
    )(x)
    # (B, H, 2, W, 2C) -> (B, 2H, 2W, C) is a free row-major relabel:
    # out5[b, i, di, j, dj*C + c] == x[b, i, j, c] == y[b, 2i+di, 2j+dj, c]
    return out5.reshape(B, 2 * H, 2 * W, C)


# ---------------- fused nearest-2x upsample + 3x3 same conv ----------------
#
# For output pixel (2i+di, 2j+dj) the conv-on-upsampled-input only touches
# x rows {i-1, i} (di=0) / {i, i+1} (di=1) and cols {j-1, j} (dj=0) / {j, j+1}
# (dj=1); the 3x3 taps collapse onto those 2x2 positions, so each of the 4
# phases is a 2x2 conv on x with pre-summed weights (16*C*N MACs per input
# pixel vs 36*C*N for the naive conv on the upsampled tensor).

def _fused_weights(w, b, np2):
    """w: (3,3,C,N) HWIO, b: (N,) -> rhs (2, 6C, np2) bf16, bias (1, np2) f32.

    rhs[di] maps the kernel LHS lane layout
      [rowA_L, rowA_C, rowA_R, rowB_L, rowB_C, rowB_R]   (each C lanes)
    (rowA/rowB = the two x rows used by phase di) onto output lanes
      [dj=0 channels | dj=1 channels].
    """
    C, N = w.shape[2], w.shape[3]
    # sel[d, s, k]: which original taps k collapse onto slot s for sub-pixel d.
    sel = jnp.array([[[1., 0., 0.],
                      [0., 1., 1.]],
                     [[1., 1., 0.],
                      [0., 0., 1.]]], jnp.float32)
    # wc[di, dj, a, b, c, n] = sum_{ki,kj} sel[di,a,ki] * sel[dj,b,kj] * w[ki,kj,c,n]
    wc = jnp.einsum('pak,qbl,klcn->pqabcn', sel, sel, w.astype(jnp.float32))
    zero = jnp.zeros((C, N), jnp.float32)
    halves = []
    for di in range(2):
        blocks = []
        for a in range(2):                 # row slot (earlier / later x row)
            for col in range(3):           # 0 = left-shift, 1 = center, 2 = right-shift
                left = wc[di, 0, a, 0] if col == 0 else (
                    wc[di, 0, a, 1] if col == 1 else zero)          # dj = 0 outputs
                right = wc[di, 1, a, 0] if col == 1 else (
                    wc[di, 1, a, 1] if col == 2 else zero)          # dj = 1 outputs
                blocks.append(jnp.concatenate([left, right], axis=-1))   # (C, 2N)
        halves.append(jnp.concatenate(blocks, axis=0))                    # (6C, 2N)
    rhs = jnp.stack(halves, axis=0)                                       # (2, 6C, 2N)
    bias2 = jnp.concatenate([b, b]).astype(jnp.float32)                   # (2N,)
    if np2 != 2 * N:
        rhs = jnp.pad(rhs, ((0, 0), (0, 0), (0, np2 - 2 * N)))
        bias2 = jnp.pad(bias2, (0, np2 - 2 * N))
    return rhs.astype(jnp.bfloat16), bias2.reshape(1, np2)


def _make_fused_up_conv_kernel(th):
    def kernel(x_ref, xt_ref, xb_ref, w_ref, b_ref, o_ref):
        t = pl.program_id(1)
        nt = pl.num_programs(1)

        xm = x_ref[0]                                        # (TH, W, C) bf16
        xtop = xt_ref[0] * (t > 0).astype(x_ref.dtype)       # zero above row 0
        xbot = xb_ref[0] * (t < nt - 1).astype(x_ref.dtype)  # zero below row H-1

        TH, W, C = xm.shape
        if th > 1:
            xu = jnp.concatenate([xtop, xm[:-1]], axis=0)    # slot i -> x[i-1]
            xd = jnp.concatenate([xm[1:], xbot], axis=0)     # slot i -> x[i+1]
        else:
            xu, xd = xtop, xbot

        zc = jnp.zeros((TH, 1, C), xm.dtype)

        def col3(r):
            # lane-concat of [left-shift, center, right-shift] column variants
            l = jnp.concatenate([zc, r[:, :-1, :]], axis=1)
            rr = jnp.concatenate([r[:, 1:, :], zc], axis=1)
            return jnp.concatenate([l, r, rr], axis=-1)      # (TH, W, 3C)

        xu3 = col3(xu)
        xc3 = col3(xm)
        xd3 = col3(xd)

        lhs0 = jnp.concatenate([xu3, xc3], axis=-1).reshape(TH * W, 6 * C)   # di = 0
        lhs1 = jnp.concatenate([xc3, xd3], axis=-1).reshape(TH * W, 6 * C)   # di = 1

        bias = b_ref[...]                                    # (1, Np2) f32
        y0 = jnp.dot(lhs0, w_ref[0], preferred_element_type=jnp.float32) + bias
        y1 = jnp.dot(lhs1, w_ref[1], preferred_element_type=jnp.float32) + bias

        npk = o_ref.shape[-1]
        o_ref[0, :, 0, :, :] = y0.reshape(TH, W, npk).astype(o_ref.dtype)    # rows 2i
        o_ref[0, :, 1, :, :] = y1.reshape(TH, W, npk).astype(o_ref.dtype)    # rows 2i+1
    return kernel


def _pick_fused_row_tile(h, w, c, np2, budget=6 << 20):
    """Largest divisor of h keeping double-buffered blocks + working set under budget."""
    best = 1
    for th in range(1, h + 1):
        if h % th:
            continue
        in_b = (th + 2) * w * c * 2              # bf16 rows incl. halos
        out_b = th * 2 * w * np2 * 4             # f32 output block
        work = 8 * th * w * 3 * c * 2            # col3 / lhs working set (rough)
        if 2 * (in_b + out_b) + work <= budget:
            best = th
    return best


def upsample2x_conv3x3(x, w, b):
    """Fused nearest-2x upsample + 3x3 'same' conv.
    x: (B, H, W, C) NHWC; w: (3, 3, C, N) HWIO; b: (N,).  Returns (B, 2H, 2W, N) f32."""
    B, H, W, C = x.shape
    N = w.shape[-1]
    np2 = _round_up(2 * N, 128)                  # lane-dense output (no pad for C=64)
    rhs, bias = _fused_weights(w, b, np2)
    xbf = x.astype(jnp.bfloat16)
    th = _pick_fused_row_tile(H, W, C, np2)

    main_map = lambda bb, t: (bb, t, 0, 0)
    top_map = lambda bb, t: (bb, jnp.maximum(t * th - 1, 0), 0, 0)       # clamped halo
    bot_map = lambda bb, t: (bb, jnp.minimum(t * th + th, H - 1), 0, 0)  # clamped halo

    out = pl.pallas_call(
        _make_fused_up_conv_kernel(th),
        grid=(B, H // th),
        in_specs=[
            pl.BlockSpec((1, th, W, C), main_map),
            pl.BlockSpec((1, 1, W, C), top_map),
            pl.BlockSpec((1, 1, W, C), bot_map),
            pl.BlockSpec((2, 6 * C, np2), lambda bb, t: (0, 0, 0)),  # weights: VMEM-resident
            pl.BlockSpec((1, np2), lambda bb, t: (0, 0)),            # bias:    VMEM-resident
        ],
        out_specs=pl.BlockSpec((1, th, 2, W, np2), lambda bb, t: (bb, t, 0, 0, 0)),
        out_shape=jax.ShapeDtypeStruct((B, H, 2, W, np2), jnp.float32),
        compiler_params=pltpu.CompilerParams(
            dimension_semantics=("parallel", "parallel"),
            vmem_limit_bytes=32 * 1024 * 1024),
    )(xbf, xbf, xbf, rhs, bias)

    if np2 == 2 * N:
        # (B, H, 2, W, 2N) -> (B, 2H, 2W, N): free row-major relabel.
        return out.reshape(B, 2 * H, 2 * W, N)
    # General-C fallback (padded lanes): strip pad then relabel.
    return out[..., :2 * N].reshape(B, H, 2, W, 2, N).reshape(B, 2 * H, 2 * W, N)


# --------------------------- module: Upsample ------------------------------

def init_upsample(key, channels):
    kw, kb = jax.random.split(key)
    fan_in = 9 * channels
    w = jax.random.normal(kw, (3, 3, channels, channels), jnp.float32) / math.sqrt(fan_in)
    b = 0.01 * jax.random.normal(kb, (channels,), jnp.float32)
    return {"w": w, "b": b}


def upsample_forward(params, x_nchw, *, with_conv=False):
    if with_conv:
        # bf16 cast fused with the NCHW->NHWC transpose (halves input HBM traffic).
        x = jnp.transpose(x_nchw.astype(jnp.bfloat16), (0, 2, 3, 1))
        y = upsample2x_conv3x3(x, params["w"], params["b"])
    else:
        x = jnp.transpose(x_nchw, (0, 2, 3, 1))
        y = upsample_nearest_2x(x)
    return jnp.transpose(y, (0, 3, 1, 2))                    # NHWC -> NCHW


# ----------------------------------- main -----------------------------------

if __name__ == "__main__":
    key = jax.random.PRNGKey(0)
    kp, kx = jax.random.split(key)

    B, C, H, W = 2, 64, 16, 16                               # 2C = 128 -> lane-dense
    x = jax.random.normal(kx, (B, C, H, W), jnp.float32)

    # ---- with_conv=False path ----------------------------------------------
    fwd_plain = jax.jit(partial(upsample_forward, with_conv=False))
    y0 = fwd_plain({}, x)
    jax.block_until_ready(y0)
    assert y0.shape == (B, C, 2 * H, 2 * W), y0.shape
    ref0 = jnp.repeat(jnp.repeat(x, 2, axis=2), 2, axis=3)
    assert bool(jnp.array_equal(y0, ref0))

    # ---- with_conv=True path -----------------------------------------------
    params = init_upsample(kp, C)
    fwd_conv = jax.jit(partial(upsample_forward, with_conv=True))
    y1 = fwd_conv(params, x)
    jax.block_until_ready(y1)
    assert y1.shape == (B, C, 2 * H, 2 * W), y1.shape
    assert bool(jnp.all(jnp.isfinite(y1)))

    # Reference: f32 nearest upsample + f32 3x3 conv (PyTorch semantics).
    # The kernel runs bf16 activations/weights on the MXU with f32 accumulation,
    # so allow a bf16-level tolerance.
    up_ref = jnp.transpose(ref0, (0, 2, 3, 1))
    ref1 = lax.conv_general_dilated(
        up_ref, params["w"], window_strides=(1, 1), padding=((1, 1), (1, 1)),
        dimension_numbers=("NHWC", "HWIO", "NHWC"),
        precision=lax.Precision.HIGHEST)
    ref1 = ref1 + params["b"][None, None, None, :]
    ref1 = jnp.transpose(ref1, (0, 3, 1, 2))
    err = float(jnp.max(jnp.abs(y1 - ref1)))
    assert err < 5e-2, err

    print("KERNEL_OK")
</pallas_src>

<mosaic_0001>
module attributes {stable_mosaic.version = 11 : i64} {
  func.func @_upsample2x_kernel(%arg0: i32, %arg1: i32, %arg2: memref<1x16x16x64xf32, #tpu.memory_space<vmem>>, %arg3: memref<1x16x2x16x128xf32, #tpu.memory_space<vmem>>) attributes {dimension_semantics = [#tpu.dimension_semantics<parallel>, #tpu.dimension_semantics<parallel>], iteration_bounds = array<i64: 2, 1>, scalar_prefetch = 0 : i64, scratch_operands = 0 : i64, tpu.core_type = #tpu.core_type<tc>, window_params = [{transform_indices = @transform_0, window_bounds = array<i64: 1, 16, 16, 64>}, {transform_indices = @transform_1, window_bounds = array<i64: 1, 16, 2, 16, 128>}]} {
    %c0 = arith.constant 0 : index
    %c0_0 = arith.constant 0 : index
    %c0_1 = arith.constant 0 : index
    %c0_2 = arith.constant 0 : index
    %0 = vector.load %arg2[%c0, %c0_0, %c0_1, %c0_2] : memref<1x16x16x64xf32, #tpu.memory_space<vmem>>, vector<1x16x16x64xf32>
    %1 = vector.shape_cast %0 : vector<1x16x16x64xf32> to vector<16x16x64xf32>
    %2 = tpu.concatenate %1, %1 in 2 : vector<16x16x64xf32>, vector<16x16x64xf32> -> vector<16x16x128xf32>
    %c0_3 = arith.constant 0 : index
    %c0_4 = arith.constant 0 : index
    %c0_5 = arith.constant 0 : index
    %c0_6 = arith.constant 0 : index
    %c0_7 = arith.constant 0 : index
    %3 = vector.load %arg3[%c0_3, %c0_4, %c0_5, %c0_6, %c0_7] : memref<1x16x2x16x128xf32, #tpu.memory_space<vmem>>, vector<1x16x1x16x128xf32>
    %4 = vector.shape_cast %3 : vector<1x16x1x16x128xf32> to vector<16x16x128xf32>
    %5 = vector.shape_cast %2 : vector<16x16x128xf32> to vector<1x16x1x16x128xf32>
    tpu.vector_store %arg3[%c0_3, %c0_4, %c0_5, %c0_6, %c0_7], %5 {strides = array<i32>} : memref<1x16x2x16x128xf32, #tpu.memory_space<vmem>>, vector<1x16x1x16x128xf32>,
    %c0_8 = arith.constant 0 : index
    %c0_9 = arith.constant 0 : index
    %c1 = arith.constant 1 : index
    %c0_10 = arith.constant 0 : index
    %c0_11 = arith.constant 0 : index
    %6 = vector.load %arg3[%c0_8, %c0_9, %c1, %c0_10, %c0_11] : memref<1x16x2x16x128xf32, #tpu.memory_space<vmem>>, vector<1x16x1x16x128xf32>
    %7 = vector.shape_cast %6 : vector<1x16x1x16x128xf32> to vector<16x16x128xf32>
    %8 = vector.shape_cast %2 : vector<16x16x128xf32> to vector<1x16x1x16x128xf32>
    tpu.vector_store %arg3[%c0_8, %c0_9, %c1, %c0_10, %c0_11], %8 {strides = array<i32>} : memref<1x16x2x16x128xf32, #tpu.memory_space<vmem>>, vector<1x16x1x16x128xf32>,
    return
  }
  func.func @transform_0(%arg0: i32, %arg1: i32) -> (i32, i32, i32, i32) {
    %c0_i32 = arith.constant 0 : i32
    %c0_i32_0 = arith.constant 0 : i32
    %c0_i32_1 = arith.constant 0 : i32
    return %arg0, %arg1, %c0_i32, %c0_i32_0 : i32, i32, i32, i32
  }
  func.func @transform_1(%arg0: i32, %arg1: i32) -> (i32, i32, i32, i32, i32) {
    %c0_i32 = arith.constant 0 : i32
    %c0_i32_0 = arith.constant 0 : i32
    %c0_i32_1 = arith.constant 0 : i32
    %c0_i32_2 = arith.constant 0 : i32
    return %arg0, %arg1, %c0_i32, %c0_i32_0, %c0_i32_1 : i32, i32, i32, i32, i32
  }
}

</mosaic_0001>

<bundles_post_ra>
// kernel: upsample_forward.1
= control target key start
LH: loop header
LB: loop body
LE: loop exit
PB: predicated region body
PF: predicated region fallthrough
CT: control target
= control target key end

     0   :  { %6 = vsyncpa [#allocation3], 0  ;;  %s1144_s0 = inlined_call_operand.hbm [shape: f32[2,16,16,64], index: 0, kind: input, shape index: {}]   ;;  %s1145_s1 = inlined_call_operand.vmem [shape: f32[2,16,2,16,128], index: 1, kind: output, shape index: {}]  }
   0x1   :  { %8 = vsyncpa [#allocation3 + $0x1], 0  ;;  %s728_s6 = smov 0   ;;  %s730_s7 = smov 0  }
   0x2   :  { %s732_s8 = smov 0   ;;  %s734_s9 = smov 0  }
   0x3   :  { %s736_s10 = smov 0   ;;  %s738_s11 = smov 0  }
   0x4 LB: > { %s527_s12 = sadd.s32 4294967295, %s712_s11   ;;  %s26_s13 = sadd.s32 1, %s708_s10  ;;  %s712_s11 = sphi %s738_s11, %s14_s11   ;;  %s708_s10 = sphi %s736_s10, %s1153_s10   ;;  %s704_s9 = sphi %s734_s9, %s1152_s9   ;;  %s700_s8 = sphi %s732_s8, %s1151_s8   ;;  %s696_s7 = sphi %s730_s7, %s1150_s7   ;;  %s692_s6 = sphi %s728_s6, %s1149_s6  }
   0x5   : > { %p28_p0 = scmp.ge.s32.totalorder %s26_s13, 2  ;;  %s35_s14 = sadd.s32 1, %s700_s8 }
   0x6   : > { %p42_p1 = scmp.ne.s32.totalorder %s700_s8, %s696_s7  ;;  %p43_p2 = scmp.eq.s32.totalorder %s712_s11, 0 }
   0x7   : > { %s1155_s13 = smov (%p28_p0, %s26_s13), 0  ;;  %p48_p4 = scmp.ne.s32.totalorder %s696_s7, %s692_s6 }
   0x8   : > { %p764_p3 = por %p43_p2, %p42_p1  ;;  %s30_s16 = ssub.s32 %s708_s10, %s1155_s13 }
   0x9   : > { %p49_p5 = scmp.eq.s32.totalorder %s527_s12, 0  ;;  %p33_p6 = scmp.eq.s32.totalorder %s30_s16, 0 }
   0xa   : > { %p580_p8 = scmp.lt.s32.totalorder %s712_s11, 2  ;;  %s100_s19 = sand.u32 1, %s700_s8  }
   0xb   : > { %p771_p7 = por %p49_p5, %p48_p4  ;;  %s572_s20 = sshll.u32 %s708_s10, 12 }
   0xc   : > { %s777_s18 = scalar_select %p33_p6, %s700_s8, %s35_s14  }
   0xd   : > { %s531_s21 = sshll.u32 %s100_s19, 8  ;;  %s784_s24 = scalar_lea.hbm %s1144_s0, %s572_s20 }
   0xe   : > { %s104_s25 = scalar_lea.vmem [#allocation2], %s531_s21  ;;  %p788_p9 = pnand %p580_p8, %p764_p3 }
   0xf   : > { %s114_s26 = sshll.u32 %s104_s25, 4  ;;  %s794_s28 = scalar_lea.sflag [#allocation3], %s100_s19  ;;  %s792_s26 = int_to_ptr.vmem [resolvable:$true] %s114_s26 }
  0x10   : > { %s632_s29 = scalar_lea.hbm %s784_s24, 4096  ;;  %p634_p11 = pneg %p788_p9 }
  0x11   : > { %p633_p10 = scmp.ne.s32.totalorder %s784_s24, %s632_s29  ;;  %s637_s3 = scalar_lea.hbm %s1144_s0, 8192 }
  0x12   : > { %p638_p0 = scmp.lt.u32.totalorder %s784_s24, %s1144_s0  ;;  %p639_p1 = scmp.lt.u32.totalorder %s637_s3, %s632_s29 }
  0x13   : > { %p635_p12 = pnand %p634_p11, %p633_p10  ;;  %p641_p3 = scmp.lt.u32.totalorder %s632_s29, %s784_s24 }
  0x14   : > { %p640_p2 = por %p639_p1, %p638_p0 }
  0x15   : > { %p636_p13 = pneg %p635_p12 }
  0x16   : > { %p642_p4 = por %p641_p3, %p640_p2 }
  0x18   : > { %p643_p5 = pnand %p642_p4, %p636_p13 }
  0x1a   : > { %646 = shalt.err (!%p643_p5)
}
  0x1b   : > { %s647_s6 = scalar_lea.vmem %s792_s26, 4096  ;;  %s714_s12 = smov [#allocation2]  }
  0x1c   : > { %p648_p6 = scmp.ne.s32.totalorder %s792_s26, %s647_s6  ;;  %s652_s14 = sshll.u32 %s714_s12, 4  ;;  %s653_s14 = int_to_ptr.vmem [resolvable:$false] %s652_s14 }
  0x1d   : > { %s654_s15 = scalar_lea.vmem %s653_s14, 8192  ;;  %p655_p12 = scmp.lt.s32.totalorder %s792_s26, %s653_s14 }
  0x1e   : > { %p650_p8 = pnand %p648_p6, %p634_p11  ;;  %p656_p0 = scmp.lt.s32.totalorder %s654_s15, %s647_s6 }
  0x20   : > { %p651_p10 = pneg %p650_p8  ;;  %p657_p1 = por %p656_p0, %p655_p12 }
  0x22   : > { %p658_p2 = pnand %p657_p1, %p651_p10 }
  0x24   : > { %661 = shalt.err (!%p658_p2)
}
  0x25   : > { %s715_s16 = smov 128   ;;  %s716_s19 = smov 8  }
  0x26   : > { %579 = dma.hbm_to_vmem [thread:$0]  (!%p788_p9), %s784_s24, 4096, %s792_s26, %s794_s28, %s715_s16, %s715_s16, %s716_s19  }
  0x27   : > { %p534_p11 = scmp.ge.s32.totalorder %s712_s11, 1  ;;  %p122_p13 = scmp.lt.s32.totalorder %s712_s11, 3 }
  0x29   : > { %p123_p3 = pnand %p534_p11, %p122_p13 }
  0x2a   : > { %s128_s20 = sand.u32 (!%p123_p3), 1, %s696_s7  }
  0x2b   : > { %126 = sbr.rel (%p123_p3) target bundleno = 230 (0xe6), region = 24  ;;  %s535_s21 = sshll.u32 (!%p123_p3), %s128_s20, 8 }
  0x2c   : > { %s129_s22 = scalar_lea.sflag (!%p123_p3), [#allocation3], %s128_s20  ;;  %s825_s23 = scalar_lea.vmem (!%p123_p3), [#allocation2], %s535_s21 }
  0x32   : > { %687 = dma.done.wait (%p771_p7), %s129_s22, 4096  }
  0x33   : > { %689 = vsyncadd (%p771_p7), %s129_s22, 4294963200  ;;  %v832_v0 = vld [vmem:[%s825_s23 + $0x10] sm:$0xff]  ;;  %v835_v1 = vld [vmem:[%s825_s23] sm:$0xff]  ;;  %s717_s24 = smov 64   ;;  %p158_p7 = scmp.lt.s32.totalorder %s704_s9, 1  ;;  %vm328_vm0 = vcmask 523264  }
  0x34   : > { %236 = vrot.lane.b32.xlu1 %v832_v0, %s717_s24  ;;  %232 = vrot.lane.b32.xlu0 %v835_v1, %s717_s24  ;;  %v842_v2 = vld [vmem:[%s825_s23 + $0x18] sm:$0xff]  ;;  %v845_v3 = vld [vmem:[%s825_s23 + $0x8] sm:$0xff] }
  0x35   : > { %v852_v4 = vld [vmem:[%s825_s23 + $0x28] sm:$0xff]  ;;  %v855_v5 = vld [vmem:[%s825_s23 + $0x20] sm:$0xff]  ;;  %v862_v6 = vld [vmem:[%s825_s23 + $0x38] sm:$0xff]  ;;  %s1157_s9 = smov (!%p158_p7, %s704_s9), 1 }
  0x36   : > { %v865_v7 = vld [vmem:[%s825_s23 + $0x30] sm:$0xff]  ;;  %v872_v8 = vld [vmem:[%s825_s23 + $0x48] sm:$0xff]  ;;  %v875_v9 = vld [vmem:[%s825_s23 + $0x40] sm:$0xff]  ;;  %s573_s17 = sshll.u32 %s1157_s9, 9 }
  0x37   : > { %v882_v10 = vld [vmem:[%s825_s23 + $0x58] sm:$0xff]  ;;  %v885_v11 = vld [vmem:[%s825_s23 + $0x50] sm:$0xff]  ;;  %v892_v12 = vld [vmem:[%s825_s23 + $0x68] sm:$0xff]  ;;  %s996_s27 = scalar_lea.vmem %s1145_s1, %s573_s17 }
  0x38   : > { %238 = vrot.lane.b32.xlu1 %v842_v2, %s717_s24  ;;  %234 = vrot.lane.b32.xlu0 %v845_v3, %s717_s24  ;;  %v895_v13 = vld [vmem:[%s825_s23 + $0x60] sm:$0xff]  ;;  %v902_v14 = vld [vmem:[%s825_s23 + $0x78] sm:$0xff] }
  0x39   : > { %v905_v15 = vld [vmem:[%s825_s23 + $0x70] sm:$0xff]  ;;  %v912_v16 = vld [vmem:[%s825_s23 + $0x88] sm:$0xff]  ;;  %v915_v17 = vld [vmem:[%s825_s23 + $0x80] sm:$0xff] }
  0x3a   : > { %v922_v18 = vld [vmem:[%s825_s23 + $0x98] sm:$0xff]  ;;  %v925_v19 = vld [vmem:[%s825_s23 + $0x90] sm:$0xff]  ;;  %v932_v20 = vld [vmem:[%s825_s23 + $0xa8] sm:$0xff] }
  0x3b   : > { %v935_v21 = vld [vmem:[%s825_s23 + $0xa0] sm:$0xff]  ;;  %v942_v22 = vld [vmem:[%s825_s23 + $0xb8] sm:$0xff]  ;;  %v945_v23 = vld [vmem:[%s825_s23 + $0xb0] sm:$0xff] }
  0x3c   : > { %242 = vrot.lane.b32.xlu1 %v852_v4, %s717_s24  ;;  %240 = vrot.lane.b32.xlu0 %v855_v5, %s717_s24  ;;  %v952_v24 = vld [vmem:[%s825_s23 + $0xc8] sm:$0xff]  ;;  %v955_v25 = vld [vmem:[%s825_s23 + $0xc0] sm:$0xff] }
  0x3d   : > { %v962_v26 = vld [vmem:[%s825_s23 + $0xd8] sm:$0xff]  ;;  %v965_v27 = vld [vmem:[%s825_s23 + $0xd0] sm:$0xff]  ;;  %v972_v28 = vld [vmem:[%s825_s23 + $0xe8] sm:$0xff] }
  0x3e   : > { %v975_v29 = vld [vmem:[%s825_s23 + $0xe0] sm:$0xff]  ;;  %v982_v30 = vld [vmem:[%s825_s23 + $0xf8] sm:$0xff]  ;;  %v985_v31 = vld [vmem:[%s825_s23 + $0xf0] sm:$0xff] }
  0x40   : > { %246 = vrot.lane.b32.xlu1 %v862_v6, %s717_s24  ;;  %244 = vrot.lane.b32.xlu0 %v865_v7, %s717_s24 }
  0x44   : > { %250 = vrot.lane.b32.xlu1 %v872_v8, %s717_s24  ;;  %248 = vrot.lane.b32.xlu0 %v875_v9, %s717_s24 }
  0x48   : > { %254 = vrot.lane.b32.xlu1 %v882_v10, %s717_s24  ;;  %252 = vrot.lane.b32.xlu0 %v885_v11, %s717_s24 }
  0x4c   : > { %258 = vrot.lane.b32.xlu1 %v892_v12, %s717_s24  ;;  %256 = vrot.lane.b32.xlu0 %v895_v13, %s717_s24 }
  0x50   : > { %262 = vrot.lane.b32.xlu1 %v902_v14, %s717_s24  ;;  %260 = vrot.lane.b32.xlu0 %v905_v15, %s717_s24 }
  0x54   : > { %266 = vrot.lane.b32.xlu1 %v912_v16, %s717_s24  ;;  %264 = vrot.lane.b32.xlu0 %v915_v17, %s717_s24 }
  0x58   : > { %270 = vrot.lane.b32.xlu1 %v922_v18, %s717_s24  ;;  %268 = vrot.lane.b32.xlu0 %v925_v19, %s717_s24 }
  0x5c   : > { %274 = vrot.lane.b32.xlu1 %v932_v20, %s717_s24  ;;  %272 = vrot.lane.b32.xlu0 %v935_v21, %s717_s24 }
  0x60   : > { %278 = vrot.lane.b32.xlu1 %v942_v22, %s717_s24  ;;  %276 = vrot.lane.b32.xlu0 %v945_v23, %s717_s24 }
  0x64   : > { %282 = vrot.lane.b32.xlu1 %v952_v24, %s717_s24  ;;  %280 = vrot.lane.b32.xlu0 %v955_v25, %s717_s24 }
  0x68   : > { %286 = vrot.lane.b32.xlu1 %v962_v26, %s717_s24  ;;  %284 = vrot.lane.b32.xlu0 %v965_v27, %s717_s24 }
  0x6c   : > { %290 = vrot.lane.b32.xlu1 %v972_v28, %s717_s24  ;;  %288 = vrot.lane.b32.xlu0 %v975_v29, %s717_s24 }
  0x70   : > { %294 = vrot.lane.b32.xlu1 %v982_v30, %s717_s24  ;;  %292 = vrot.lane.b32.xlu0 %v985_v31, %s717_s24 }
  0xa6   : > { %v237_v32 = vpop.permute.xlu1 %236  ;;  %v233_v33 = vpop.permute.xlu0 %232 }
  0xa7   : > { %v331_v34 = vsel %vm328_vm0, %v832_v0, %v237_v32  ;;  %v329_v35 = vsel %vm328_vm0, %v835_v1, %v233_v33 }
  0xa8   : > { %363 = vst [vmem:[%s996_s27 + $0x20] sm:$0xff] %v331_v34  ;;  %540 = vst [vmem:[%s996_s27 + $0x30] sm:$0xff] %v331_v34 }
  0xa9   : > { %361 = vst [vmem:[%s996_s27] sm:$0xff] %v329_v35  ;;  %538 = vst [vmem:[%s996_s27 + $0x10] sm:$0xff] %v329_v35 }
  0xaa   : > { %v239_v36 = vpop.permute.xlu1 %238  ;;  %v235_v37 = vpop.permute.xlu0 %234 }
  0xab   : > { %v332_v38 = vsel %vm328_vm0, %v842_v2, %v239_v36  ;;  %v330_v39 = vsel %vm328_vm0, %v845_v3, %v235_v37 }
  0xac   : > { %364 = vst [vmem:[%s996_s27 + $0x28] sm:$0xff] %v332_v38  ;;  %541 = vst [vmem:[%s996_s27 + $0x38] sm:$0xff] %v332_v38 }
  0xad   : > { %362 = vst [vmem:[%s996_s27 + $0x8] sm:$0xff] %v330_v39  ;;  %539 = vst [vmem:[%s996_s27 + $0x18] sm:$0xff] %v330_v39 }
  0xae   : > { %v243_v40 = vpop.permute.xlu1 %242  ;;  %v241_v41 = vpop.permute.xlu0 %240 }
  0xaf   : > { %v334_v42 = vsel %vm328_vm0, %v852_v4, %v243_v40  ;;  %v333_v43 = vsel %vm328_vm0, %v855_v5, %v241_v41 }
  0xb0   : > { %366 = vst [vmem:[%s996_s27 + $0x48] sm:$0xff] %v334_v42  ;;  %543 = vst [vmem:[%s996_s27 + $0x58] sm:$0xff] %v334_v42 }
  0xb1   : > { %365 = vst [vmem:[%s996_s27 + $0x40] sm:$0xff] %v333_v43  ;;  %542 = vst [vmem:[%s996_s27 + $0x50] sm:$0xff] %v333_v43 }
  0xb2   : > { %v247_v44 = vpop.permute.xlu1 %246  ;;  %v245_v45 = vpop.permute.xlu0 %244 }
  0xb3   : > { %v336_v46 = vsel %vm328_vm0, %v862_v6, %v247_v44  ;;  %v335_v47 = vsel %vm328_vm0, %v865_v7, %v245_v45 }
  0xb4   : > { %368 = vst [vmem:[%s996_s27 + $0x68] sm:$0xff] %v336_v46  ;;  %545 = vst [vmem:[%s996_s27 + $0x78] sm:$0xff] %v336_v46 }
  0xb5   : > { %367 = vst [vmem:[%s996_s27 + $0x60] sm:$0xff] %v335_v47  ;;  %544 = vst [vmem:[%s996_s27 + $0x70] sm:$0xff] %v335_v47 }
  0xb6   : > { %v251_v48 = vpop.permute.xlu1 %250  ;;  %v249_v49 = vpop.permute.xlu0 %248 }
  0xb7   : > { %v338_v50 = vsel %vm328_vm0, %v872_v8, %v251_v48  ;;  %v337_v51 = vsel %vm328_vm0, %v875_v9, %v249_v49 }
  0xb8   : > { %370 = vst [vmem:[%s996_s27 + $0x88] sm:$0xff] %v338_v50  ;;  %547 = vst [vmem:[%s996_s27 + $0x98] sm:$0xff] %v338_v50 }
  0xb9   : > { %369 = vst [vmem:[%s996_s27 + $0x80] sm:$0xff] %v337_v51  ;;  %546 = vst [vmem:[%s996_s27 + $0x90] sm:$0xff] %v337_v51 }
  0xba   : > { %v255_v52 = vpop.permute.xlu1 %254  ;;  %v253_v53 = vpop.permute.xlu0 %252 }
  0xbb   : > { %v340_v54 = vsel %vm328_vm0, %v882_v10, %v255_v52  ;;  %v339_v55 = vsel %vm328_vm0, %v885_v11, %v253_v53 }
  0xbc   : > { %372 = vst [vmem:[%s996_s27 + $0xa8] sm:$0xff] %v340_v54  ;;  %549 = vst [vmem:[%s996_s27 + $0xb8] sm:$0xff] %v340_v54 }
  0xbd   : > { %371 = vst [vmem:[%s996_s27 + $0xa0] sm:$0xff] %v339_v55  ;;  %548 = vst [vmem:[%s996_s27 + $0xb0] sm:$0xff] %v339_v55 }
  0xbe   : > { %v259_v56 = vpop.permute.xlu1 %258  ;;  %v257_v57 = vpop.permute.xlu0 %256 }
  0xbf   : > { %v342_v58 = vsel %vm328_vm0, %v892_v12, %v259_v56  ;;  %v341_v59 = vsel %vm328_vm0, %v895_v13, %v257_v57 }
  0xc0   : > { %374 = vst [vmem:[%s996_s27 + $0xc8] sm:$0xff] %v342_v58  ;;  %551 = vst [vmem:[%s996_s27 + $0xd8] sm:$0xff] %v342_v58 }
  0xc1   : > { %373 = vst [vmem:[%s996_s27 + $0xc0] sm:$0xff] %v341_v59  ;;  %550 = vst [vmem:[%s996_s27 + $0xd0] sm:$0xff] %v341_v59 }
  0xc2   : > { %v263_v60 = vpop.permute.xlu1 %262  ;;  %v261_v61 = vpop.permute.xlu0 %260 }
  0xc3   : > { %v344_v62 = vsel %vm328_vm0, %v902_v14, %v263_v60  ;;  %v343_v63 = vsel %vm328_vm0, %v905_v15, %v261_v61 }
  0xc4   : > { %376 = vst [vmem:[%s996_s27 + $0xe8] sm:$0xff] %v344_v62  ;;  %553 = vst [vmem:[%s996_s27 + $0xf8] sm:$0xff] %v344_v62 }
  0xc5   : > { %375 = vst [vmem:[%s996_s27 + $0xe0] sm:$0xff] %v343_v63  ;;  %552 = vst [vmem:[%s996_s27 + $0xf0] sm:$0xff] %v343_v63 }
  0xc6   : > { %v267_v0 = vpop.permute.xlu1 %266  ;;  %v265_v1 = vpop.permute.xlu0 %264 }
  0xc7   : > { %v346_v2 = vsel %vm328_vm0, %v912_v16, %v267_v0  ;;  %v345_v3 = vsel %vm328_vm0, %v915_v17, %v265_v1 }
  0xc8   : > { %378 = vst [vmem:[%s996_s27 + $0x108] sm:$0xff] %v346_v2  ;;  %555 = vst [vmem:[%s996_s27 + $0x118] sm:$0xff] %v346_v2 }
  0xc9   : > { %377 = vst [vmem:[%s996_s27 + $0x100] sm:$0xff] %v345_v3  ;;  %554 = vst [vmem:[%s996_s27 + $0x110] sm:$0xff] %v345_v3 }
  0xca   : > { %v271_v4 = vpop.permute.xlu1 %270  ;;  %v269_v5 = vpop.permute.xlu0 %268 }
  0xcb   : > { %v348_v6 = vsel %vm328_vm0, %v922_v18, %v271_v4  ;;  %v347_v7 = vsel %vm328_vm0, %v925_v19, %v269_v5 }
  0xcc   : > { %380 = vst [vmem:[%s996_s27 + $0x128] sm:$0xff] %v348_v6  ;;  %557 = vst [vmem:[%s996_s27 + $0x138] sm:$0xff] %v348_v6 }
  0xcd   : > { %379 = vst [vmem:[%s996_s27 + $0x120] sm:$0xff] %v347_v7  ;;  %556 = vst [vmem:[%s996_s27 + $0x130] sm:$0xff] %v347_v7 }
  0xce   : > { %v275_v8 = vpop.permute.xlu1 %274  ;;  %v273_v9 = vpop.permute.xlu0 %272 }
  0xcf   : > { %v350_v10 = vsel %vm328_vm0, %v932_v20, %v275_v8  ;;  %v349_v11 = vsel %vm328_vm0, %v935_v21, %v273_v9 }
  0xd0   : > { %382 = vst [vmem:[%s996_s27 + $0x148] sm:$0xff] %v350_v10  ;;  %559 = vst [vmem:[%s996_s27 + $0x158] sm:$0xff] %v350_v10 }
  0xd1   : > { %381 = vst [vmem:[%s996_s27 + $0x140] sm:$0xff] %v349_v11  ;;  %558 = vst [vmem:[%s996_s27 + $0x150] sm:$0xff] %v349_v11 }
  0xd2   : > { %v279_v12 = vpop.permute.xlu1 %278  ;;  %v277_v13 = vpop.permute.xlu0 %276 }
  0xd3   : > { %v352_v14 = vsel %vm328_vm0, %v942_v22, %v279_v12  ;;  %v351_v15 = vsel %vm328_vm0, %v945_v23, %v277_v13 }
  0xd4   : > { %384 = vst [vmem:[%s996_s27 + $0x168] sm:$0xff] %v352_v14  ;;  %561 = vst [vmem:[%s996_s27 + $0x178] sm:$0xff] %v352_v14 }
  0xd5   : > { %383 = vst [vmem:[%s996_s27 + $0x160] sm:$0xff] %v351_v15  ;;  %560 = vst [vmem:[%s996_s27 + $0x170] sm:$0xff] %v351_v15 }
  0xd6   : > { %v283_v16 = vpop.permute.xlu1 %282  ;;  %v281_v17 = vpop.permute.xlu0 %280 }
  0xd7   : > { %v354_v18 = vsel %vm328_vm0, %v952_v24, %v283_v16  ;;  %v353_v19 = vsel %vm328_vm0, %v955_v25, %v281_v17 }
  0xd8   : > { %386 = vst [vmem:[%s996_s27 + $0x188] sm:$0xff] %v354_v18  ;;  %563 = vst [vmem:[%s996_s27 + $0x198] sm:$0xff] %v354_v18 }
  0xd9   : > { %385 = vst [vmem:[%s996_s27 + $0x180] sm:$0xff] %v353_v19  ;;  %562 = vst [vmem:[%s996_s27 + $0x190] sm:$0xff] %v353_v19 }
  0xda   : > { %v287_v20 = vpop.permute.xlu1 %286  ;;  %v285_v21 = vpop.permute.xlu0 %284 }
  0xdb   : > { %v356_v22 = vsel %vm328_vm0, %v962_v26, %v287_v20  ;;  %v355_v23 = vsel %vm328_vm0, %v965_v27, %v285_v21 }
  0xdc   : > { %388 = vst [vmem:[%s996_s27 + $0x1a8] sm:$0xff] %v356_v22  ;;  %565 = vst [vmem:[%s996_s27 + $0x1b8] sm:$0xff] %v356_v22 }
  0xdd   : > { %387 = vst [vmem:[%s996_s27 + $0x1a0] sm:$0xff] %v355_v23  ;;  %564 = vst [vmem:[%s996_s27 + $0x1b0] sm:$0xff] %v355_v23 }
  0xde   : > { %v291_v24 = vpop.permute.xlu1 %290  ;;  %v289_v25 = vpop.permute.xlu0 %288 }
  0xdf   : > { %v358_v32 = vsel %vm328_vm0, %v972_v28, %v291_v24  ;;  %v357_v33 = vsel %vm328_vm0, %v975_v29, %v289_v25 }
  0xe0   : > { %390 = vst [vmem:[%s996_s27 + $0x1c8] sm:$0xff] %v358_v32  ;;  %567 = vst [vmem:[%s996_s27 + $0x1d8] sm:$0xff] %v358_v32 }
  0xe1   : > { %389 = vst [vmem:[%s996_s27 + $0x1c0] sm:$0xff] %v357_v33  ;;  %566 = vst [vmem:[%s996_s27 + $0x1d0] sm:$0xff] %v357_v33 }
  0xe2   : > { %v295_v26 = vpop.permute.xlu1 %294  ;;  %v293_v27 = vpop.permute.xlu0 %292 }
  0xe3   : > { %v360_v34 = vsel %vm328_vm0, %v982_v30, %v295_v26  ;;  %v359_v35 = vsel %vm328_vm0, %v985_v31, %v293_v27 }
  0xe4   : > { %392 = vst [vmem:[%s996_s27 + $0x1e8] sm:$0xff] %v360_v34  ;;  %569 = vst [vmem:[%s996_s27 + $0x1f8] sm:$0xff] %v360_v34 }
  0xe5   : > { %391 = vst [vmem:[%s996_s27 + $0x1e0] sm:$0xff] %v359_v35  ;;  %568 = vst [vmem:[%s996_s27 + $0x1f0] sm:$0xff] %v359_v35 }
  0xe6 PF: > { %s14_s11 = sadd.s32 1, %s712_s11   ;;  %s1149_s6 = smov %s696_s7 }
  0xe7   : > { %p11_p9 = scmp.ge.s32.totalorder %s14_s11, 4   ;;  %s1150_s7 = smov %s700_s8 }
  0xe8   : > { %s1151_s8 = smov %s777_s18  ;;  %s1152_s9 = smov %s708_s10 }
  0xe9   : > { %s1153_s10 = smov %s1155_s13  ;;  %13 = sbr.rel (!%p11_p9) target bundleno = 4 (0x4), region = 65 }
  0xf0   :  { %458 = vsyncpa [#allocation3], 1 }
  0xf1   :  { %460 = vsyncpa [#allocation3 + $0x1], 1 }

</bundles_post_ra>
